<compile_context>
chip_gen: v7x
topology: tpu7x:2x2x1
jax: 0.10.0
libtpu: 0.0.40
codegen_flags: <defaults>
</compile_context>

<pallas_src>
import functools
import math

import jax
import jax.numpy as jnp
from jax import lax
from jax.experimental import pallas as pl
from jax.experimental.pallas import tpu as pltpu


def _round_up(v, m):
    return ((v + m - 1) // m) * m


def _pad_to(a, shape):
    pads = [(0, t - s) for s, t in zip(a.shape, shape)]
    if any(p for _, p in pads):
        a = jnp.pad(a, pads)
    return a


def _vmem_budget_bytes():
    """Per-generation VMEM budget: ~75% of physical (48 MiB v7x, 96 MiB v5e/v6e)."""
    try:
        cap = int(pltpu.get_tpu_info().vmem_capacity_bytes)
    except Exception:
        cap = 64 * 1024 * 1024          # conservative fallback (v7x-sized)
    budget = (cap * 3) // 4
    return max(32 * 2**20, min(budget, 112 * 2**20))


def _pick_time_chunk(seq_len, b_p, h_p, i_p, out_bytes, budget, cap=256):
    """Largest t_chunk whose double-buffered blocks + resident weights fit budget."""
    # recurrent kernel: GI (bf16) + out double-buffered per timestep, W_hh^T resident
    rec_fixed = h_p * 3 * h_p * 2 + 3 * b_p * h_p * 4 + 3 * h_p * 4
    rec_per_t = 2 * b_p * 3 * h_p * 2 + 2 * b_p * h_p * out_bytes
    # projection kernel: x + GI blocks double-buffered, W_ih^T resident
    proj_fixed = i_p * 3 * h_p * 2 + 3 * h_p * 4
    proj_per_t = 2 * b_p * i_p * 2 + 2 * b_p * 3 * h_p * 2
    fixed = max(rec_fixed, proj_fixed)
    per_t = max(rec_per_t, proj_per_t)
    t = (budget - fixed) // max(per_t, 1)
    return int(max(1, min(t, seq_len, cap)))


# ----------------------------------------------------------------------------
# Kernel 1: tiled, parallel input projection  GI = x @ W_ih^T + folded biases
# ----------------------------------------------------------------------------
def _input_proj_kernel(x_ref, w_ref, b_ref, gi_ref):
    # x_ref: (TR, Ip) bf16, w_ref: (Ip, 3Hp) bf16 (resident), b_ref: (1, 3Hp) f32
    gi = jnp.dot(x_ref[...], w_ref[...], preferred_element_type=jnp.float32)
    gi_ref[...] = (gi + b_ref[...]).astype(gi_ref.dtype)


# ----------------------------------------------------------------------------
# Kernel 2: sequential recurrence.  One grid step = t_chunk timesteps.
# ----------------------------------------------------------------------------
def _gru_recurrent_kernel(gi_ref, h0_ref, whh_t_ref, bn_ref,
                          out_ref, hn_ref, h_scratch, *, seq_len, unroll):
    c = pl.program_id(0)
    t_chunk, b_p, h_p = out_ref.shape

    @pl.when(c == 0)
    def _():
        h_scratch[...] = h0_ref[...]          # f32 carried hidden state

    # Hoisted broadcast of the n-gate hidden bias (JAX does not CSE it).
    b_n = jnp.broadcast_to(bn_ref[...], (b_p, h_p))
    needs_mask = (seq_len % t_chunk) != 0     # static Python bool
    base = c * t_chunk

    def body(g, h):
        # Small static unroll inside a fori_loop: bounded live ranges,
        # straight-line window for the scheduler.
        for u in range(unroll):
            tt = g * unroll + u
            gi = gi_ref[tt].astype(jnp.float32)               # (Bp, 3Hp)
            hb = h.astype(jnp.bfloat16)                       # bf16 MXU operand
            # One fused (Bp,Hp)x(Hp,3Hp) MXU op per timestep (f32 accumulate).
            gh = jnp.dot(hb, whh_t_ref[...],
                         preferred_element_type=jnp.float32)  # (Bp, 3Hp)
            # Lane-aligned gate slices (Hp is a multiple of 128).
            r = jax.nn.sigmoid(gi[:, :h_p] + gh[:, :h_p])
            z = jax.nn.sigmoid(gi[:, h_p:2 * h_p] + gh[:, h_p:2 * h_p])
            n = jnp.tanh(gi[:, 2 * h_p:] + r * (gh[:, 2 * h_p:] + b_n))
            h_new = (1.0 - z) * n + z * h
            if needs_mask:                                    # padded tail steps
                h_new = jnp.where(base + tt < seq_len, h_new, h)
            out_ref[tt] = h_new.astype(out_ref.dtype)
            h = h_new
        return h

    h = lax.fori_loop(0, t_chunk // unroll, body, h_scratch[...])
    h_scratch[...] = h
    # Written every chunk (cheap, resident constant-index block flushes once
    # at the end of the grid) -> no reliance on "last step only" semantics.
    hn_ref[...] = h.astype(hn_ref.dtype)


# ----------------------------------------------------------------------------
# One GRU layer, one direction.
# ----------------------------------------------------------------------------
def gru_layer_forward(x, h0, w_ih, w_hh, b_ih, b_hh, *, t_chunk=None):
    """x: (S, B, I); h0: (B, H); w_ih: (3H, I); w_hh: (3H, H); b_*: (3H,).
    Returns output (S, B, H) and h_n (B, H)."""
    S, B, I = x.shape
    H = h0.shape[-1]
    f32, bf16 = jnp.float32, jnp.bfloat16

    # Internal lane/sublane padding: lane-dense stores, tile-aligned gate slices.
    h_p = _round_up(H, 128)
    b_p = _round_up(B, 8)
    i_p = _round_up(I, 128)

    budget = _vmem_budget_bytes()
    out_bytes = jnp.dtype(x.dtype).itemsize
    if t_chunk is None:
        t_chunk = _pick_time_chunk(S, b_p, h_p, i_p, out_bytes, budget)
    UNROLL = 4
    if t_chunk >= UNROLL:
        t_chunk = (t_chunk // UNROLL) * UNROLL
        unroll = UNROLL
    else:
        unroll = t_chunk
    n_chunks = -(-S // t_chunk)
    s_pad = n_chunks * t_chunk

    # ---- host-side weight / bias prep (once per layer call) ----
    # Gate-padded, pre-transposed weights; gates laid out as columns [r|z|n].
    w_ih_g = _pad_to(w_ih.reshape(3, H, I), (3, h_p, i_p))
    wih_t = jnp.transpose(w_ih_g, (2, 0, 1)).reshape(i_p, 3 * h_p).astype(bf16)
    w_hh_g = _pad_to(w_hh.reshape(3, H, H), (3, h_p, h_p))
    whh_t = jnp.transpose(w_hh_g, (2, 0, 1)).reshape(h_p, 3 * h_p).astype(bf16)

    b_ih_g = _pad_to(b_ih.reshape(3, H).astype(f32), (3, h_p))
    b_hh_g = _pad_to(b_hh.reshape(3, H).astype(f32), (3, h_p))
    # Fold b_ih (all gates) + b_hh (r, z) into the precomputed GI; only the
    # n-gate hidden bias stays inside the loop (it is scaled by r_t).
    b_fold = jnp.concatenate(
        [b_ih_g[0] + b_hh_g[0], b_ih_g[1] + b_hh_g[1], b_ih_g[2]]
    ).reshape(1, 3 * h_p)
    b_n = b_hh_g[2].reshape(1, h_p)

    x_pad = _pad_to(x, (s_pad, b_p, i_p)).astype(bf16)
    x2d = x_pad.reshape(s_pad * b_p, i_p)            # free reshape
    h0p = _pad_to(h0.astype(f32), (b_p, h_p))

    # ---- tiled, parallel input projection (hoisted out of the recurrence) ----
    rows_per_chunk = t_chunk * b_p
    gi2d = pl.pallas_call(
        _input_proj_kernel,
        out_shape=jax.ShapeDtypeStruct((s_pad * b_p, 3 * h_p), bf16),
        grid_spec=pltpu.PrefetchScalarGridSpec(
            num_scalar_prefetch=0,
            grid=(n_chunks,),
            in_specs=[
                pl.BlockSpec((rows_per_chunk, i_p), lambda r: (r, 0)),
                pl.BlockSpec((i_p, 3 * h_p), lambda r: (0, 0)),
                pl.BlockSpec((1, 3 * h_p), lambda r: (0, 0)),
            ],
            out_specs=pl.BlockSpec((rows_per_chunk, 3 * h_p), lambda r: (r, 0)),
        ),
        compiler_params=pltpu.CompilerParams(
            dimension_semantics=("parallel",),
            vmem_limit_bytes=int(budget),
        ),
    )(x2d, wih_t, b_fold)
    gi = gi2d.reshape(s_pad, b_p, 3 * h_p)           # free reshape, no transpose

    # ---- sequential recurrence over time, t_chunk steps per grid step ----
    out_pad, h_n = pl.pallas_call(
        functools.partial(_gru_recurrent_kernel, seq_len=S, unroll=unroll),
        out_shape=(
            jax.ShapeDtypeStruct((s_pad, b_p, h_p), x.dtype),
            jax.ShapeDtypeStruct((b_p, h_p), x.dtype),
        ),
        grid_spec=pltpu.PrefetchScalarGridSpec(
            num_scalar_prefetch=0,
            grid=(n_chunks,),
            in_specs=[
                pl.BlockSpec((t_chunk, b_p, 3 * h_p), lambda c: (c, 0, 0)),  # GI
                pl.BlockSpec((b_p, h_p), lambda c: (0, 0)),                  # h0
                pl.BlockSpec((h_p, 3 * h_p), lambda c: (0, 0)),              # W_hh^T
                pl.BlockSpec((1, h_p), lambda c: (0, 0)),                    # b_hh_n
            ],
            out_specs=[
                pl.BlockSpec((t_chunk, b_p, h_p), lambda c: (c, 0, 0)),      # output
                pl.BlockSpec((b_p, h_p), lambda c: (0, 0)),                  # h_n
            ],
            scratch_shapes=[pltpu.VMEM((b_p, h_p), f32)],                    # carried h
        ),
        compiler_params=pltpu.CompilerParams(
            dimension_semantics=("arbitrary",),      # true time recurrence
            vmem_limit_bytes=int(budget),
        ),
    )(gi, h0p, whh_t, b_n)

    return out_pad[:S, :B, :H], h_n[:B, :H]


# ----------------------------------------------------------------------------
# Full-module forward (num_layers / bidirectional / batch_first composition).
# ----------------------------------------------------------------------------
def _gru_forward_impl(layer_fn, x, hx, params, num_layers, bidirectional,
                      batch_first):
    if batch_first:
        x = jnp.transpose(x, (1, 0, 2))
    S, B, _ = x.shape
    num_directions = 2 if bidirectional else 1
    H = params[0][1].shape[-1]
    if hx is None:
        hx = jnp.zeros((num_layers * num_directions, B, H), dtype=x.dtype)

    h_n = []
    layer_input = x
    for layer in range(num_layers):
        dir_outs = []
        for direction in range(num_directions):
            idx = layer * num_directions + direction
            w_ih, w_hh, b_ih, b_hh = params[idx]
            xi = layer_input if direction == 0 else jnp.flip(layer_input, axis=0)
            # TODO(synk): on v7x, stack fwd + reversed inputs along batch and run
            # both directions in one recurrent pallas_call (2 TC parallel axis).
            out_d, hn_d = layer_fn(xi, hx[idx], w_ih, w_hh, b_ih, b_hh)
            if direction == 1:
                out_d = jnp.flip(out_d, axis=0)
            dir_outs.append(out_d)
            h_n.append(hn_d)
        layer_input = (dir_outs[0] if num_directions == 1
                       else jnp.concatenate(dir_outs, axis=2))
        # TODO(synk): training-mode inter-layer dropout not implemented
        # (inference behaviour: identity).
    output = layer_input
    if batch_first:
        output = jnp.transpose(output, (1, 0, 2))
    return output, jnp.stack(h_n, axis=0)


def gru_forward(x, hx, params, *, num_layers=1, bidirectional=False,
                batch_first=False):
    return _gru_forward_impl(gru_layer_forward, x, hx, params, num_layers,
                             bidirectional, batch_first)


# ----------------------------------------------------------------------------
# Pure-JAX reference (lax.scan) for correctness checking.
# ----------------------------------------------------------------------------
def gru_layer_reference(x, h0, w_ih, w_hh, b_ih, b_hh):
    H = h0.shape[-1]

    def step(h, x_t):
        gi = x_t @ w_ih.T + b_ih
        gh = h @ w_hh.T + b_hh
        i_r, i_z, i_n = gi[:, :H], gi[:, H:2 * H], gi[:, 2 * H:]
        h_r, h_z, h_nn = gh[:, :H], gh[:, H:2 * H], gh[:, 2 * H:]
        r = jax.nn.sigmoid(i_r + h_r)
        z = jax.nn.sigmoid(i_z + h_z)
        n = jnp.tanh(i_n + r * h_nn)
        h_new = (1.0 - z) * n + z * h
        return h_new, h_new

    h_last, outs = lax.scan(step, h0, x)
    return outs, h_last


def gru_reference(x, hx, params, *, num_layers=1, bidirectional=False,
                  batch_first=False):
    return _gru_forward_impl(gru_layer_reference, x, hx, params, num_layers,
                             bidirectional, batch_first)


# ----------------------------------------------------------------------------
# Parameter init mirroring the module's reset_parameters.
# ----------------------------------------------------------------------------
def init_gru_params(key, input_size, hidden_size, num_layers=1,
                    bidirectional=False):
    num_directions = 2 if bidirectional else 1
    stdv = 1.0 / math.sqrt(hidden_size)
    params = []
    for layer in range(num_layers):
        for _direction in range(num_directions):
            key, k1, k2, k3, k4 = jax.random.split(key, 5)
            in_sz = input_size if layer == 0 else hidden_size * num_directions
            w_ih = jax.random.uniform(k1, (3 * hidden_size, in_sz),
                                      minval=-stdv, maxval=stdv,
                                      dtype=jnp.float32)
            a = jax.random.normal(k2, (3 * hidden_size, hidden_size),
                                  dtype=jnp.float32)
            q, r = jnp.linalg.qr(a)
            w_hh = (q * jnp.sign(jnp.diagonal(r))).astype(jnp.float32)

            def make_bias(k):
                b = jax.random.uniform(k, (3 * hidden_size,), minval=-stdv,
                                       maxval=stdv, dtype=jnp.float32)
                return b.at[hidden_size:2 * hidden_size].set(1.0)

            params.append((w_ih, w_hh, make_bias(k3), make_bias(k4)))
    return params


if __name__ == "__main__":
    S, B, I, H = 8, 2, 16, 32
    key = jax.random.PRNGKey(0)
    kx, kp1, kp2 = jax.random.split(key, 3)
    x = jax.random.normal(kx, (S, B, I), dtype=jnp.float32)

    # --- config 1: module defaults (1 layer, unidirectional, seq-first) ---
    params1 = init_gru_params(kp1, I, H, num_layers=1, bidirectional=False)
    out, h_n = gru_forward(x, None, params1, num_layers=1, bidirectional=False)
    jax.block_until_ready((out, h_n))
    out_r, h_r = gru_reference(x, None, params1, num_layers=1,
                               bidirectional=False)
    assert out.shape == (S, B, H) and h_n.shape == (1, B, H)
    # bf16 matmul operands / bf16 GI storage (f32 accumulation) -> loose tol
    assert jnp.allclose(out, out_r, rtol=2e-2, atol=2e-2), "output mismatch (1L)"
    assert jnp.allclose(h_n, h_r, rtol=2e-2, atol=2e-2), "h_n mismatch (1L)"

    # --- config 2: 2 layers, bidirectional, batch_first ---
    xb = jnp.transpose(x, (1, 0, 2))  # (B, S, I)
    params2 = init_gru_params(kp2, I, H, num_layers=2, bidirectional=True)
    out2, hn2 = gru_forward(xb, None, params2, num_layers=2,
                            bidirectional=True, batch_first=True)
    jax.block_until_ready((out2, hn2))
    out2_r, hn2_r = gru_reference(xb, None, params2, num_layers=2,
                                  bidirectional=True, batch_first=True)
    assert out2.shape == (B, S, 2 * H) and hn2.shape == (4, B, H)
    assert jnp.allclose(out2, out2_r, rtol=5e-2, atol=5e-2), "output mismatch (2L-bi)"
    assert jnp.allclose(hn2, hn2_r, rtol=5e-2, atol=5e-2), "h_n mismatch (2L-bi)"

    print("KERNEL_OK")
</pallas_src>

<mosaic_0001>
module attributes {stable_mosaic.version = 11 : i64} {
  func.func @_input_proj_kernel(%arg0: i32, %arg1: memref<64x128xbf16, #tpu.memory_space<vmem>>, %arg2: memref<128x384xbf16, #tpu.memory_space<vmem>>, %arg3: memref<1x384xf32, #tpu.memory_space<vmem>>, %arg4: memref<64x384xbf16, #tpu.memory_space<vmem>>) attributes {dimension_semantics = [#tpu.dimension_semantics<parallel>], iteration_bounds = array<i64: 1>, scalar_prefetch = 0 : i64, scratch_operands = 0 : i64, tpu.core_type = #tpu.core_type<tc>, window_params = [{transform_indices = @transform_0, window_bounds = array<i64: 64, 128>}, {pipeline_mode = #tpu.pipeline_mode<synchronous>, transform_indices = @transform_1, window_bounds = array<i64: 128, 384>}, {pipeline_mode = #tpu.pipeline_mode<synchronous>, transform_indices = @transform_2, window_bounds = array<i64: 1, 384>}, {transform_indices = @transform_3, window_bounds = array<i64: 64, 384>}]} {
    %c0 = arith.constant 0 : index
    %c0_0 = arith.constant 0 : index
    %0 = vector.load %arg1[%c0, %c0_0] : memref<64x128xbf16, #tpu.memory_space<vmem>>, vector<64x128xbf16>
    %c0_1 = arith.constant 0 : index
    %c0_2 = arith.constant 0 : index
    %1 = vector.load %arg2[%c0_1, %c0_2] : memref<128x384xbf16, #tpu.memory_space<vmem>>, vector<128x384xbf16>
    %cst = arith.constant dense<0.000000e+00> : vector<64x384xf32>
    %2 = tpu.matmul %0, %1, %cst {dimension_numbers = #tpu.dot_dimension_numbers<[1], [0], [0], [1], [0, 0, 1, 1], [], []>} : vector<64x128xbf16>, vector<128x384xbf16>, vector<64x384xf32> -> vector<64x384xf32>
    %c0_3 = arith.constant 0 : index
    %c0_4 = arith.constant 0 : index
    %3 = vector.load %arg3[%c0_3, %c0_4] : memref<1x384xf32, #tpu.memory_space<vmem>>, vector<1x384xf32>
    %4 = vector.broadcast %3 : vector<1x384xf32> to vector<64x384xf32>
    %5 = arith.addf %2, %4 : vector<64x384xf32>
    %6 = arith.truncf %5 : vector<64x384xf32> to vector<64x384xbf16>
    %c0_5 = arith.constant 0 : index
    %c0_6 = arith.constant 0 : index
    %7 = vector.load %arg4[%c0_5, %c0_6] : memref<64x384xbf16, #tpu.memory_space<vmem>>, vector<64x384xbf16>
    tpu.vector_store %arg4[%c0_5, %c0_6], %6 {strides = array<i32>} : memref<64x384xbf16, #tpu.memory_space<vmem>>, vector<64x384xbf16>,
    return
  }
  func.func @transform_0(%arg0: i32) -> (i32, i32) {
    %c0_i32 = arith.constant 0 : i32
    %c0_i32_0 = arith.constant 0 : i32
    return %arg0, %c0_i32 : i32, i32
  }
  func.func @transform_1(%arg0: i32) -> (i32, i32) {
    %c0_i32 = arith.constant 0 : i32
    %c0_i32_0 = arith.constant 0 : i32
    %c0_i32_1 = arith.constant 0 : i32
    return %c0_i32, %c0_i32_0 : i32, i32
  }
  func.func @transform_2(%arg0: i32) -> (i32, i32) {
    %c0_i32 = arith.constant 0 : i32
    %c0_i32_0 = arith.constant 0 : i32
    %c0_i32_1 = arith.constant 0 : i32
    return %c0_i32, %c0_i32_0 : i32, i32
  }
  func.func @transform_3(%arg0: i32) -> (i32, i32) {
    %c0_i32 = arith.constant 0 : i32
    %c0_i32_0 = arith.constant 0 : i32
    return %arg0, %c0_i32 : i32, i32
  }
}

</mosaic_0001>

<bundles_post_ra>
// kernel: tpu_custom_call.1
= control target key start
LH: loop header
LB: loop body
LE: loop exit
PB: predicated region body
PF: predicated region fallthrough
CT: control target
= control target key end

     0   :  { %8 = vsyncpa [#allocation3], 0  ;;  %s814_s0 = inlined_call_operand.hbm [shape: bf16[64,128], index: 0, kind: input, shape index: {}]   ;;  %s815_s1 = inlined_call_operand.hbm [shape: bf16[128,384], index: 1, kind: input, shape index: {}]   ;;  %s816_s2 = inlined_call_operand.vmem [shape: f32[1,384], index: 2, kind: input, shape index: {}]   ;;  %s817_s3 = inlined_call_operand.hbm [shape: bf16[64,384], index: 3, kind: output, shape index: {}]  }
   0x1   :  { %9 = vsyncpa [#allocation6], 0 }
   0x2   :  { %10 = vsyncpa [#allocation4], 0  ;;  %s717_s12 = smov [#allocation2]   ;;  %s645_s16 = scalar_lea.hbm %s814_s0, 512 }
   0x3   :  { %s16_s13 = sshll.u32 %s717_s12, 4  ;;  %p646_p0 = scmp.ne.s32.totalorder %s814_s0, %s645_s16  ;;  %s17_s13 = int_to_ptr.vmem [resolvable:$true] %s16_s13 }
   0x4   :  { %p649_p1 = scmp.lt.u32.totalorder %s645_s16, %s814_s0 }
   0x6   :  { %p651_p2 = pnand %p649_p1, %p646_p0 }
   0x8   :  { %654 = shalt.err (!%p651_p2)
}
   0x9   :  { %s655_s21 = scalar_lea.vmem %s17_s13, 512  ;;  %p660_p4 = scmp.lt.s32.totalorder %s17_s13, %s17_s13 }
   0xa   :  { %p656_p3 = scmp.ne.s32.totalorder %s17_s13, %s655_s21  ;;  %p661_p5 = scmp.lt.s32.totalorder %s655_s21, %s655_s21 }
   0xc   :  { %p662_p6 = por %p661_p5, %p660_p4 }
   0xe   :  { %p663_p7 = pnand %p662_p6, %p656_p3 }
  0x10   :  { %666 = shalt.err (!%p663_p7)
}
  0x11   :  { %s718_s22 = smov 64   ;;  %s719_s23 = smov 4  }
  0x12   :  { %22 = dma.hbm_to_vmem [thread:$0]  %s814_s0, 512, %s17_s13, [#allocation3], %s718_s22, %s718_s22, %s719_s23  }
  0x13   :  { %s720_s26 = smov [#allocation5]   ;;  %s667_s30 = scalar_lea.hbm %s815_s1, 3072 }
  0x14   :  { %s28_s27 = sshll.u32 %s720_s26, 4  ;;  %p668_p8 = scmp.ne.s32.totalorder %s815_s1, %s667_s30  ;;  %s29_s27 = int_to_ptr.vmem [resolvable:$true] %s28_s27 }
  0x15   :  { %p671_p9 = scmp.lt.u32.totalorder %s667_s30, %s815_s1 }
  0x17   :  { %p673_p10 = pnand %p671_p9, %p668_p8 }
  0x19   :  { %676 = shalt.err (!%p673_p10)
}
  0x1a   :  { %s677_s8 = scalar_lea.vmem %s29_s27, 3072  ;;  %p682_p12 = scmp.lt.s32.totalorder %s29_s27, %s29_s27 }
  0x1b   :  { %p678_p11 = scmp.ne.s32.totalorder %s29_s27, %s677_s8  ;;  %p683_p13 = scmp.lt.s32.totalorder %s677_s8, %s677_s8 }
  0x1d   :  { %p684_p0 = por %p683_p13, %p682_p12 }
  0x1f   :  { %p685_p1 = pnand %p684_p0, %p678_p11 }
  0x21   :  { %688 = shalt.err (!%p685_p1)
}
  0x22   :  { %s721_s0 = smov 192   ;;  %s722_s9 = smov 12  }
  0x23   :  { %34 = dma.hbm_to_vmem [thread:$0]  %s815_s1, 3072, %s29_s27, [#allocation6], %s721_s0, %s721_s0, %s722_s9  }
  0x24   :  { %711 = dma.done.wait [#allocation3], 512  }
  0x25   :  { %712 = vsyncadd [#allocation3], 4294966784 }
  0x26   :  { %713 = dma.done.wait [#allocation6], 3072  }
  0x27   :  { %714 = vsyncadd [#allocation6], 4294964224  ;;  %v723_v0 = vmov 0   ;;  %v609_v1 = vld [vmem:[#allocation5 + $0x4] ss:$12 sps:$4 sm:$0xff]   ;;  %v641_v26 = vld [vmem:[#allocation2 + $0x8] sm:$0xff]   ;;  %v86_v29 = vlaneseq }
  0x28   :  { %285 = vmatprep.mubr.bf16.mxu0 %v723_v0  ;;  %v611_v2 = vld [vmem:[#allocation5] ss:$12 sps:$4 sm:$0xff]   ;;  %253 = vmatprep.subr.bf16.mxu0 %v609_v1  ;;  %v612_v3 = vld [vmem:[#allocation5 + $0x1c] ss:$12 sps:$4 sm:$0xff]   ;;  %v614_v4 = vld [vmem:[#allocation5 + $0x18] ss:$12 sps:$4 sm:$0xff]  }
  0x29   :  { %254 = vmatpush1.bf16.msra.mxu0 %v611_v2  ;;  %v615_v5 = vld [vmem:[#allocation5 + $0x34] ss:$12 sps:$4 sm:$0xff]   ;;  %v617_v7 = vld [vmem:[#allocation5 + $0x30] ss:$12 sps:$4 sm:$0xff]   ;;  %v618_v8 = vld [vmem:[#allocation5 + $0x4c] ss:$12 sps:$4 sm:$0xff]  }
  0x2a   :  { %255 = vmatprep.subr.bf16.mxu0 %v612_v3  ;;  %v621_v6 = vld [vmem:[#allocation5 + $0x8] ss:$12 sps:$4 sm:$0xff]   ;;  %v625_v9 = vld [vmem:[#allocation5 + $0x20] ss:$12 sps:$4 sm:$0xff]   ;;  %v629_v10 = vld [vmem:[#allocation5 + $0x38] ss:$12 sps:$4 sm:$0xff]  }
  0x2b   :  { %577 = vmatprep.subr.bf16.mxu1 %v621_v6  ;;  %v620_v11 = vld [vmem:[#allocation5 + $0x48] ss:$12 sps:$4 sm:$0xff]   ;;  %v622_v12 = vld [vmem:[#allocation5 + $0x64] ss:$12 sps:$4 sm:$0xff]   ;;  %v624_v13 = vld [vmem:[#allocation5 + $0x60] ss:$12 sps:$4 sm:$0xff]  }
  0x2c   :  { %578 = vmatpush3.bf16.msra.mxu1 %v621_v6  ;;  %v633_v14 = vld [vmem:[#allocation5 + $0x50] ss:$12 sps:$4 sm:$0xff]   ;;  %v638_v16 = vld [vmem:[#allocation2] sm:$0xff]   ;;  %v637_v17 = vld [vmem:[#allocation5 + $0x68] ss:$12 sps:$4 sm:$0xff]   ;;  %v87_v30 = vshrl.u32 %v86_v29, 7 }
  0x2d   :  { %256 = vmatpush1.bf16.msra.mxu0 %v614_v4  ;;  %579 = vmatprep.subr.bf16.mxu1 %v625_v9  ;;  %v626_v15 = vld [vmem:[#allocation5 + $0x7c] ss:$12 sps:$4 sm:$0xff]   ;;  %v628_v18 = vld [vmem:[#allocation5 + $0x78] ss:$12 sps:$4 sm:$0xff]   ;;  %v630_v19 = vld [vmem:[#allocation5 + $0x94] ss:$12 sps:$4 sm:$0xff]  }
  0x2e   :  { %257 = vmatprep.subr.bf16.mxu0 %v615_v5  ;;  %593 = vmatprep.mubr.bf16.mxu1 %v638_v16  ;;  %v639_v20 = vld [vmem:[#allocation5 + $0x80] ss:$12 sps:$4 sm:$0xff]   ;;  %v632_v21 = vld [vmem:[#allocation5 + $0x90] ss:$12 sps:$4 sm:$0xff]   ;;  %v640_v23 = vld [vmem:[#allocation5 + $0x98] ss:$12 sps:$4 sm:$0xff]  }
  0x2f   :  { %v634_v22 = vld [vmem:[#allocation5 + $0xac] ss:$12 sps:$4 sm:$0xff]   ;;  %v636_v24 = vld [vmem:[#allocation5 + $0xa8] ss:$12 sps:$4 sm:$0xff]   ;;  %v642_v25 = vld [vmem:[#allocation5 + $0xb0] ss:$12 sps:$4 sm:$0xff]  }
  0x30   :  { %580 = vmatpush3.bf16.msra.mxu1 %v625_v9  ;;  %v643_v27 = vld [vmem:[#allocation2 + $0x10] sm:$0xff]   ;;  %v644_v28 = vld [vmem:[#allocation2 + $0x18] sm:$0xff]   ;;  %v88_v31 = vsub.s32 0, %v87_v30  ;;  %v84_v32 = vld [vmem:[%s816_s2] sm:$0x7]  ;;  %v92_v33 = vsub.s32 1, %v87_v30 }
  0x31   :  { %258 = vmatpush1.bf16.msra.mxu0 %v617_v7  ;;  %581 = vmatprep.subr.bf16.mxu1 %v629_v10  ;;  %v96_v36 = vsub.s32 2, %v87_v30  ;;  %s724_s2 = smov [#allocation7]  }
  0x32   :  { %259 = vmatprep.subr.bf16.mxu0 %v618_v8  ;;  %v779_v34 = vrot.slane %v84_v32, %v88_v31  ;;  %v781_v35 = vrot.slane %v84_v32, %v92_v33  ;;  %s492_s13 = sshll.u32 %s724_s2, 4  ;;  %s493_s13 = int_to_ptr.vmem [resolvable:$true] %s492_s13 }
  0x33   :  { %v97_v44 = vrot.slane %v84_v32, %v96_v36  ;;  %s689_s14 = scalar_lea.vmem %s493_s13, 1536  ;;  %p694_p3 = scmp.lt.s32.totalorder %s493_s13, %s493_s13 }
  0x34   :  { %582 = vmatpush3.bf16.msra.mxu1 %v629_v10  ;;  %p690_p2 = scmp.ne.s32.totalorder %s493_s13, %s689_s14  ;;  %p695_p4 = scmp.lt.s32.totalorder %s689_s14, %s689_s14 }
  0x35   :  { %260 = vmatpush1.bf16.msra.mxu0 %v620_v11  ;;  %583 = vmatprep.subr.bf16.mxu1 %v633_v14 }
  0x36   :  { %261 = vmatprep.subr.bf16.mxu0 %v622_v12  ;;  %p696_p5 = por %p695_p4, %p694_p3 }
  0x38   :  { %584 = vmatpush3.bf16.msra.mxu1 %v633_v14  ;;  %p697_p6 = pnand %p696_p5, %p690_p2 }
  0x39   :  { %262 = vmatpush1.bf16.msra.mxu0 %v624_v13  ;;  %585 = vmatprep.subr.bf16.mxu1 %v637_v17 }
  0x3a   :  { %263 = vmatprep.subr.bf16.mxu0 %v626_v15 }
  0x3c   :  { %586 = vmatpush3.bf16.msra.mxu1 %v637_v17 }
  0x3d   :  { %264 = vmatpush1.bf16.msra.mxu0 %v628_v18  ;;  %587 = vmatprep.subr.bf16.mxu1 %v639_v20 }
  0x3e   :  { %265 = vmatprep.subr.bf16.mxu0 %v630_v19 }
  0x40   :  { %588 = vmatpush3.bf16.msra.mxu1 %v639_v20 }
  0x41   :  { %266 = vmatpush1.bf16.msra.mxu0 %v632_v21  ;;  %589 = vmatprep.subr.bf16.mxu1 %v640_v23 }
  0x42   :  { %267 = vmatprep.subr.bf16.mxu0 %v634_v22 }
  0x44   :  { %590 = vmatpush3.bf16.msra.mxu1 %v640_v23 }
  0x45   :  { %268 = vmatpush1.bf16.msra.mxu0 %v636_v24  ;;  %591 = vmatprep.subr.bf16.mxu1 %v642_v25 }
  0x48   :  { %286 = vmatmul.mubr.bf16.vlgmr.msra.gmra.mrb[0].mxu0 %v638_v16  ;;  %592 = vmatpush3.bf16.msra.mxu1 %v642_v25 }
  0x49   :  { %295 = vmatprep.mubr.bf16.mxu0 %v723_v0 }
  0x4b   :  { %594 = vmatmul.mubr.bf16.vlgmr.msra.gmra.mrb[0].mxu1 %v641_v26 }
  0x4c   :  { %597 = vmatprep.mubr.bf16.mxu1 %v643_v27 }
  0x50   :  { %296 = vmatmul.mubr.bf16.gmra.mrb[4].mxu0 %v641_v26 }
  0x51   :  { %305 = vmatprep.mubr.bf16.mxu0 %v723_v0 }
  0x53   :  { %598 = vmatmul.mubr.bf16.gmra.mrb[4].mxu1 %v644_v28 }
  0x58   :  { %306 = vmatmul.mubr.bf16.gmra.mrb[8].mxu0 %v643_v27 }
  0x59   :  { %315 = vmatprep.mubr.bf16.mxu0 %v723_v0 }
  0x60   :  { %316 = vmatmul.mubr.bf16.gmra.mrb[12].mxu0 %v644_v28 }
 0x11b   :  { %v287_v37 = vpop.f32.mrb[0].mxu0 }
 0x11c   :  { %v288_v38 = vadd.f32 %v287_v37, %v779_v34  ;;  %v289_v39 = vpop.f32.mrb[1].mxu0 }
 0x11d   :  { %v290_v40 = vadd.f32 %v289_v39, %v781_v35  ;;  %v291_v41 = vpop.f32.mrb[2].mxu0 }
 0x11e   :  { %v292_v42 = vadd.f32 %v291_v41, %v779_v34  ;;  %v293_v43 = vpop.f32.mrb[3].mxu0  ;;  %v595_v48 = vpop.f32.mrb[0].mxu1 }
 0x11f   :  { %v549_v45 = vpack.c.bf16 %v290_v40, %v288_v38  ;;  %v294_v46 = vadd.f32 %v293_v43, %v781_v35  ;;  %v369_v49 = vadd.f32 %v595_v48, %v97_v44  ;;  %v360_v50 = vpop.f32.mrb[1].mxu1 }
 0x120   :  { %v361_v52 = vadd.f32 %v360_v50, %v97_v44  ;;  %v596_v53 = vpop.f32.mrb[2].mxu1 }
 0x121   :  { %471 = vst [vmem:[#allocation7] sm:$0xff] %v549_v45  ;;  %v551_v47 = vpack.c.bf16 %v294_v46, %v292_v42  ;;  %v554_v56 = vpack.c.bf16 %v369_v49, %v369_v49  ;;  %v372_v57 = vadd.f32 %v596_v53, %v97_v44  ;;  %v363_v58 = vpop.f32.mrb[3].mxu1 }
 0x122   :  { %v550_v61 = vpack.c.bf16 %v361_v52, %v361_v52  ;;  %v364_v62 = vadd.f32 %v363_v58, %v97_v44 }
 0x123   :  { %473 = vst [vmem:[#allocation7 + $0xc] sm:$0xff] %v551_v47  ;;  %v297_v51 = vpop.f32.mrb[4].mxu0  ;;  %476 = vst [vmem:[#allocation7 + $0x20] sm:$0xf] %v554_v56  ;;  %v556_v1 = vpack.c.bf16 %v372_v57, %v372_v57 }
 0x124   :  { %v298_v54 = vadd.f32 %v297_v51, %v779_v34  ;;  %v299_v55 = vpop.f32.mrb[5].mxu0  ;;  %472 = vst [vmem:[#allocation7 + $0x8] sm:$0xf] %v550_v61  ;;  %v552_v4 = vpack.c.bf16 %v364_v62, %v364_v62 }
 0x125   :  { %v300_v59 = vadd.f32 %v299_v55, %v781_v35  ;;  %v301_v60 = vpop.f32.mrb[6].mxu0  ;;  %478 = vst [vmem:[#allocation7 + $0x2c] sm:$0xf] %v556_v1 }
 0x126   :  { %v302_v63 = vadd.f32 %v301_v60, %v779_v34  ;;  %v303_v0 = vpop.f32.mrb[7].mxu0  ;;  %474 = vst [vmem:[#allocation7 + $0x14] sm:$0xf] %v552_v4  ;;  %v599_v6 = vpop.f32.mrb[4].mxu1 }
 0x127   :  { %v553_v2 = vpack.c.bf16 %v300_v59, %v298_v54  ;;  %v304_v3 = vadd.f32 %v303_v0, %v781_v35  ;;  %v385_v7 = vadd.f32 %v599_v6, %v97_v44  ;;  %v376_v8 = vpop.f32.mrb[5].mxu1 }
 0x128   :  { %v377_v10 = vadd.f32 %v376_v8, %v97_v44  ;;  %v600_v11 = vpop.f32.mrb[6].mxu1 }
 0x129   :  { %475 = vst [vmem:[#allocation7 + $0x18] sm:$0xff] %v553_v2  ;;  %v555_v5 = vpack.c.bf16 %v304_v3, %v302_v63  ;;  %v562_v14 = vpack.c.bf16 %v385_v7, %v385_v7  ;;  %v388_v15 = vadd.f32 %v600_v11, %v97_v44  ;;  %v379_v16 = vpop.f32.mrb[7].mxu1 }
 0x12a   :  { %v558_v19 = vpack.c.bf16 %v377_v10, %v377_v10  ;;  %v380_v20 = vadd.f32 %v379_v16, %v97_v44 }
 0x12b   :  { %477 = vst [vmem:[#allocation7 + $0x24] sm:$0xff] %v555_v5  ;;  %v307_v9 = vpop.f32.mrb[8].mxu0  ;;  %484 = vst [vmem:[#allocation7 + $0x50] sm:$0xf] %v562_v14  ;;  %v564_v23 = vpack.c.bf16 %v388_v15, %v388_v15 }
 0x12c   :  { %v308_v12 = vadd.f32 %v307_v9, %v779_v34  ;;  %v309_v13 = vpop.f32.mrb[9].mxu0  ;;  %480 = vst [vmem:[#allocation7 + $0x38] sm:$0xf] %v558_v19  ;;  %v560_v26 = vpack.c.bf16 %v380_v20, %v380_v20 }
 0x12d   :  { %v310_v17 = vadd.f32 %v309_v13, %v781_v35  ;;  %v311_v18 = vpop.f32.mrb[10].mxu0  ;;  %486 = vst [vmem:[#allocation7 + $0x5c] sm:$0xf] %v564_v23 }
 0x12e   :  { %v312_v21 = vadd.f32 %v311_v18, %v779_v34  ;;  %v313_v22 = vpop.f32.mrb[11].mxu0  ;;  %482 = vst [vmem:[#allocation7 + $0x44] sm:$0xf] %v560_v26 }
 0x12f   :  { %v557_v24 = vpack.c.bf16 %v310_v17, %v308_v12  ;;  %v314_v25 = vadd.f32 %v313_v22, %v781_v35 }
 0x131   :  { %479 = vst [vmem:[#allocation7 + $0x30] sm:$0xff] %v557_v24  ;;  %v559_v27 = vpack.c.bf16 %v314_v25, %v312_v21 }
 0x133   :  { %481 = vst [vmem:[#allocation7 + $0x3c] sm:$0xff] %v559_v27  ;;  %v317_v28 = vpop.f32.mrb[12].mxu0 }
 0x134   :  { %v318_v29 = vadd.f32 %v317_v28, %v779_v34  ;;  %v319_v30 = vpop.f32.mrb[13].mxu0 }
 0x135   :  { %v320_v31 = vadd.f32 %v319_v30, %v781_v35  ;;  %v321_v32 = vpop.f32.mrb[14].mxu0 }
 0x136   :  { %v322_v33 = vadd.f32 %v321_v32, %v779_v34  ;;  %v323_v36 = vpop.f32.mrb[15].mxu0 }
 0x137   :  { %v561_v37 = vpack.c.bf16 %v320_v31, %v318_v29  ;;  %v324_v38 = vadd.f32 %v323_v36, %v781_v35 }
 0x139   :  { %483 = vst [vmem:[#allocation7 + $0x48] sm:$0xff] %v561_v37  ;;  %v563_v39 = vpack.c.bf16 %v324_v38, %v322_v33 }
 0x13b   :  { %485 = vst [vmem:[#allocation7 + $0x54] sm:$0xff] %v563_v39 }
 0x13c   :  { %700 = shalt.err (!%p697_p6)
}
 0x13d   :  { %s701_s17 = scalar_lea.hbm %s817_s3, 1536 }
 0x13e   :  { %p702_p7 = scmp.ne.s32.totalorder %s817_s3, %s701_s17  ;;  %p705_p8 = scmp.lt.u32.totalorder %s701_s17, %s817_s3 }
 0x140   :  { %p707_p9 = pnand %p705_p8, %p702_p7 }
 0x142   :  { %710 = shalt.err (!%p707_p9)
}
 0x143   :  { %498 = dma.vmem_to_hbm [thread:$0]  %s493_s13, 1536, %s817_s3, [#allocation4], %s721_s0, %s721_s0, %s722_s9  }
 0x144   :  { %715 = dma.done.wait [#allocation4], 1536  }
 0x145   :  { %716 = vsyncadd [#allocation4], 4294965760 }
 0x146   :  { %502 = vsyncpa [#allocation3], 1 }
 0x147   :  { %503 = vsyncpa [#allocation6], 1 }
 0x148   :  { %504 = vsyncpa [#allocation4], 1 }

</bundles_post_ra>
